<compile_context>
chip_gen: v5e
topology: v5e:2x2
jax: 0.10.0
libtpu: 0.0.40
codegen_flags: <defaults>
</compile_context>

<pallas_src>
import jax
import jax.numpy as jnp
from jax.experimental import pallas as pl
from jax.experimental.pallas import tpu as pltpu

IN_FEATURES = 28 * 28          # 784
OUT_FEATURES = 10
LANE = 128                     # native lane width
OUT_PAD = LANE                 # lane-dense logit slab (in-register only)
DEFAULT_BLOCK_B = 512          # batch tile (amortizes grid-step overhead)
NEG_BIG = -1e30                # Python float -> folded into b4, never captured


def _round_up(n, m):
    return ((n + m - 1) // m) * m


# ----------------------------------------------------------------------------
# Kernel
# ----------------------------------------------------------------------------
def mlp3_kernel(x_ref,
                w1_ref, b1_ref,
                w2_ref, b2_ref,
                w3_ref, b3_ref,
                w4_ref, b4_ref,
                out_ref):
    """Fused: 3x (linear -> sigmoid), linear, log_softmax over a 128-lane slab.

    Scales are pre-folded into w2/w3/w4; the padded-lane mask is pre-folded
    into b4 (-1e30 on lanes >= 10).  Weights/activations feed the MXU as bf16
    with f32 accumulation; biases and all VPU/EUP math stay f32.
    """
    x = x_ref[...].astype(jnp.bfloat16)                    # cast in-kernel

    # Layer 1: (TB, 784) @ (784, H1p)
    h = jnp.dot(x, w1_ref[...], preferred_element_type=jnp.float32) + b1_ref[...]
    h = jax.nn.sigmoid(h)

    # Layer 2 (scale s1 folded into w2)
    h = jnp.dot(h.astype(jnp.bfloat16), w2_ref[...],
                preferred_element_type=jnp.float32) + b2_ref[...]
    h = jax.nn.sigmoid(h)

    # Layer 3 (scale s2 folded into w3)
    h = jnp.dot(h.astype(jnp.bfloat16), w3_ref[...],
                preferred_element_type=jnp.float32) + b3_ref[...]
    h = jax.nn.sigmoid(h)

    # Output layer (scale s3 folded into w4): lane-dense (TB, 128) slab.
    # Padded lanes get exactly b4 = -1e30 (padded w4 columns are zero).
    logits = jnp.dot(h.astype(jnp.bfloat16), w4_ref[...],
                     preferred_element_type=jnp.float32) + b4_ref[...]

    # log_softmax over the lane axis; -1e30 lanes contribute exp(.) == 0.
    m = jnp.max(logits, axis=1, keepdims=True)
    shifted = logits - m
    lse = jnp.log(jnp.sum(jnp.exp(shifted), axis=1, keepdims=True))

    # Narrow writeback: only the 10 real classes go back to HBM.
    out_ref[...] = (shifted - lse)[:, :OUT_FEATURES].astype(out_ref.dtype)


# ----------------------------------------------------------------------------
# Wrapper
# ----------------------------------------------------------------------------
def mlp3_forward(x, prepared, *, block_b=DEFAULT_BLOCK_B):
    """x: (B, 784) float32 or bfloat16. prepared: dict from prepare_params()."""
    B = x.shape[0]
    # Clamp the tile to the (sublane-rounded) batch; keep it a multiple of 8.
    block_b = max(8, min(block_b, _round_up(B, 8)))
    num_blocks = pl.cdiv(B, block_b)
    B_pad = num_blocks * block_b

    # Pad only when needed (no dtype-cast pass over x: cast happens in-kernel).
    x_p = x if B_pad == B else jnp.pad(x, ((0, B_pad - B), (0, 0)))

    w1, b1 = prepared["w1"], prepared["b1"]
    w2, b2 = prepared["w2"], prepared["b2"]
    w3, b3 = prepared["w3"], prepared["b3"]
    w4, b4 = prepared["w4"], prepared["b4"]

    # Weights/biases: full block, constant index_map -> VMEM-resident across grid.
    def const(a):
        return pl.BlockSpec(a.shape, lambda i: (0,) * a.ndim)

    out = pl.pallas_call(
        mlp3_kernel,
        out_shape=jax.ShapeDtypeStruct((B_pad, OUT_FEATURES), jnp.float32),
        grid=(num_blocks,),
        in_specs=[
            pl.BlockSpec((block_b, IN_FEATURES), lambda i: (i, 0)),   # x (streamed)
            const(w1), const(b1),
            const(w2), const(b2),
            const(w3), const(b3),
            const(w4), const(b4),
        ],
        out_specs=pl.BlockSpec((block_b, OUT_FEATURES), lambda i: (i, 0)),
        compiler_params=pltpu.CompilerParams(
            dimension_semantics=("parallel",),       # megacore split on v7x
            vmem_limit_bytes=32 * 1024 * 1024,       # generous; kernel uses <8 MiB
        ),
    )(x_p, w1, b1, w2, b2, w3, b3, w4, b4)

    return out if B_pad == B else out[:B]


# ----------------------------------------------------------------------------
# Parameter init / preparation
# ----------------------------------------------------------------------------
def init_params(key, hidden_units):
    """Init matching the PyTorch module: fc1..fc3 weights ~ N(0,1), fc4 ~ U(0,1),
    biases ~ U(-1/sqrt(fan_in), 1/sqrt(fan_in)). Weights stored (in, out)."""
    h1, h2, h3 = hidden_units
    ks = jax.random.split(key, 8)

    def bias(k, fan_in, fan_out):
        bound = 1.0 / jnp.sqrt(fan_in)
        return jax.random.uniform(k, (1, fan_out), jnp.float32, -bound, bound)

    return {
        "w1": jax.random.normal(ks[0], (IN_FEATURES, h1), jnp.float32),
        "b1": bias(ks[1], IN_FEATURES, h1),
        "w2": jax.random.normal(ks[2], (h1, h2), jnp.float32),
        "b2": bias(ks[3], h1, h2),
        "w3": jax.random.normal(ks[4], (h2, h3), jnp.float32),
        "b3": bias(ks[5], h2, h3),
        "w4": jax.random.uniform(ks[6], (h3, OUT_FEATURES), jnp.float32, 0.0, 1.0),
        "b4": bias(ks[7], h3, OUT_FEATURES),
    }


def prepare_params(params, hidden_units, gammas):
    """Fold mean-field scales into the *next* layer's weights, zero-pad hidden
    dims to 128 lanes, pad the output layer to a 128-lane slab with the lane
    mask (-1e30) folded into b4, cast MXU operands to bf16 (biases stay f32)."""
    h1, h2, h3 = hidden_units
    g1, g2, g3 = gammas
    s1 = float(h1) ** (-float(g1))
    s2 = float(h2) ** (-float(g2))
    s3 = float(h3) ** (-float(g3))

    H1 = _round_up(h1, LANE)
    H2 = _round_up(h2, LANE)
    H3 = _round_up(h3, LANE)

    def pad2(a, rows, cols):
        return jnp.pad(a, ((0, rows - a.shape[0]), (0, cols - a.shape[1])))

    # b4: real classes keep their bias, padded lanes get -1e30 (softmax mask).
    b4 = jnp.full((1, OUT_PAD), NEG_BIG, jnp.float32)
    b4 = b4.at[:, :OUT_FEATURES].set(params["b4"].astype(jnp.float32))

    return {
        "w1": pad2(params["w1"], IN_FEATURES, H1).astype(jnp.bfloat16),
        "b1": pad2(params["b1"], 1, H1).astype(jnp.float32),
        "w2": pad2(params["w2"] * s1, H1, H2).astype(jnp.bfloat16),
        "b2": pad2(params["b2"], 1, H2).astype(jnp.float32),
        "w3": pad2(params["w3"] * s2, H2, H3).astype(jnp.bfloat16),
        "b3": pad2(params["b3"], 1, H3).astype(jnp.float32),
        "w4": pad2(params["w4"] * s3, H3, OUT_PAD).astype(jnp.bfloat16),
        "b4": b4,
    }


# ----------------------------------------------------------------------------
# References
# ----------------------------------------------------------------------------
def mlp3_reference_f32(x, params, hidden_units, gammas):
    """Pure-f32 reference with the original module's semantics."""
    h1, h2, h3 = hidden_units
    g1, g2, g3 = gammas
    s1 = float(h1) ** (-float(g1))
    s2 = float(h2) ** (-float(g2))
    s3 = float(h3) ** (-float(g3))
    h = s1 * jax.nn.sigmoid(x @ params["w1"] + params["b1"])
    h = s2 * jax.nn.sigmoid(h @ params["w2"] + params["b2"])
    h = s3 * jax.nn.sigmoid(h @ params["w3"] + params["b3"])
    logits = h @ params["w4"] + params["b4"]
    return jax.nn.log_softmax(logits, axis=1)


def mlp3_reference_bf16(x, prepared):
    """Mirrors the kernel's mixed-precision numerics (bf16 MXU inputs, f32 acc)."""
    f32 = jnp.float32
    h = jnp.dot(x.astype(jnp.bfloat16), prepared["w1"],
                preferred_element_type=f32) + prepared["b1"]
    h = jax.nn.sigmoid(h)
    h = jnp.dot(h.astype(jnp.bfloat16), prepared["w2"],
                preferred_element_type=f32) + prepared["b2"]
    h = jax.nn.sigmoid(h)
    h = jnp.dot(h.astype(jnp.bfloat16), prepared["w3"],
                preferred_element_type=f32) + prepared["b3"]
    h = jax.nn.sigmoid(h)
    logits = jnp.dot(h.astype(jnp.bfloat16), prepared["w4"],
                     preferred_element_type=f32) + prepared["b4"]
    return jax.nn.log_softmax(logits[:, :OUT_FEATURES], axis=1)


# ----------------------------------------------------------------------------
if __name__ == "__main__":
    hidden_units = (32, 32, 32)
    gammas = (0.5, 0.5, 0.5)

    key = jax.random.PRNGKey(0)
    k_params, k_x = jax.random.split(key)
    params = init_params(k_params, hidden_units)
    prepared = prepare_params(params, hidden_units, gammas)

    # Input shaped like flattened MNIST (the PyTorch forward does x.view(-1, 784)).
    batch = 8
    x = jax.random.normal(k_x, (batch, IN_FEATURES), jnp.float32)

    out = mlp3_forward(x, prepared)
    out = jax.block_until_ready(out)
    assert out.shape == (batch, OUT_FEATURES)
    assert bool(jnp.all(jnp.isfinite(out)))

    # Tight check vs a reference that matches the kernel's mixed precision.
    ref_bf16 = mlp3_reference_bf16(x, prepared)
    assert jnp.allclose(out, ref_bf16, atol=5e-3, rtol=5e-3), \
        "mismatch vs bf16-matched reference"

    # Semantics check vs the original (pure f32) module math; looser tolerance
    # accounts for bf16 MXU inputs.
    ref_f32 = mlp3_reference_f32(x, params, hidden_units, gammas)
    assert jnp.allclose(out, ref_f32, atol=1e-1, rtol=1e-1), \
        "mismatch vs f32 module reference"

    print("KERNEL_OK")
</pallas_src>

<mosaic_0001>
module attributes {stable_mosaic.version = 11 : i64} {
  func.func @mlp3_kernel(%arg0: i32, %arg1: memref<8x784xf32, #tpu.memory_space<vmem>>, %arg2: memref<784x128xbf16, #tpu.memory_space<vmem>>, %arg3: memref<1x128xf32, #tpu.memory_space<vmem>>, %arg4: memref<128x128xbf16, #tpu.memory_space<vmem>>, %arg5: memref<1x128xf32, #tpu.memory_space<vmem>>, %arg6: memref<128x128xbf16, #tpu.memory_space<vmem>>, %arg7: memref<1x128xf32, #tpu.memory_space<vmem>>, %arg8: memref<128x128xbf16, #tpu.memory_space<vmem>>, %arg9: memref<1x128xf32, #tpu.memory_space<vmem>>, %arg10: memref<8x10xf32, #tpu.memory_space<vmem>>) attributes {dimension_semantics = [#tpu.dimension_semantics<parallel>], iteration_bounds = array<i64: 1>, scalar_prefetch = 0 : i64, scratch_operands = 0 : i64, tpu.core_type = #tpu.core_type<tc>, window_params = [{transform_indices = @transform_0, window_bounds = array<i64: 8, 784>}, {pipeline_mode = #tpu.pipeline_mode<synchronous>, transform_indices = @transform_1, window_bounds = array<i64: 784, 128>}, {pipeline_mode = #tpu.pipeline_mode<synchronous>, transform_indices = @transform_2, window_bounds = array<i64: 1, 128>}, {pipeline_mode = #tpu.pipeline_mode<synchronous>, transform_indices = @transform_3, window_bounds = array<i64: 128, 128>}, {pipeline_mode = #tpu.pipeline_mode<synchronous>, transform_indices = @transform_4, window_bounds = array<i64: 1, 128>}, {pipeline_mode = #tpu.pipeline_mode<synchronous>, transform_indices = @transform_5, window_bounds = array<i64: 128, 128>}, {pipeline_mode = #tpu.pipeline_mode<synchronous>, transform_indices = @transform_6, window_bounds = array<i64: 1, 128>}, {pipeline_mode = #tpu.pipeline_mode<synchronous>, transform_indices = @transform_7, window_bounds = array<i64: 128, 128>}, {pipeline_mode = #tpu.pipeline_mode<synchronous>, transform_indices = @transform_8, window_bounds = array<i64: 1, 128>}, {transform_indices = @transform_9, window_bounds = array<i64: 8, 10>}]} {
    %c0 = arith.constant 0 : index
    %c0_0 = arith.constant 0 : index
    %0 = vector.load %arg1[%c0, %c0_0] : memref<8x784xf32, #tpu.memory_space<vmem>>, vector<8x784xf32>
    %1 = arith.truncf %0 : vector<8x784xf32> to vector<8x784xbf16>
    %c0_1 = arith.constant 0 : index
    %c0_2 = arith.constant 0 : index
    %2 = vector.load %arg2[%c0_1, %c0_2] : memref<784x128xbf16, #tpu.memory_space<vmem>>, vector<784x128xbf16>
    %cst = arith.constant dense<0.000000e+00> : vector<8x128xf32>
    %3 = tpu.matmul %1, %2, %cst {dimension_numbers = #tpu.dot_dimension_numbers<[1], [0], [0], [1], [0, 0, 1, 1], [], []>} : vector<8x784xbf16>, vector<784x128xbf16>, vector<8x128xf32> -> vector<8x128xf32>
    %c0_3 = arith.constant 0 : index
    %c0_4 = arith.constant 0 : index
    %4 = vector.load %arg3[%c0_3, %c0_4] : memref<1x128xf32, #tpu.memory_space<vmem>>, vector<1x128xf32>
    %5 = vector.broadcast %4 : vector<1x128xf32> to vector<8x128xf32>
    %6 = arith.addf %3, %5 : vector<8x128xf32>
    %7 = arith.negf %6 : vector<8x128xf32>
    %8 = math.exp %7 : vector<8x128xf32>
    %cst_5 = arith.constant 1.000000e+00 : f32
    %9 = vector.broadcast %cst_5 : f32 to vector<8x128xf32>
    %10 = arith.addf %9, %8 : vector<8x128xf32>
    %11 = arith.divf %9, %10 : vector<8x128xf32>
    %12 = arith.truncf %11 : vector<8x128xf32> to vector<8x128xbf16>
    %c0_6 = arith.constant 0 : index
    %c0_7 = arith.constant 0 : index
    %13 = vector.load %arg4[%c0_6, %c0_7] : memref<128x128xbf16, #tpu.memory_space<vmem>>, vector<128x128xbf16>
    %cst_8 = arith.constant dense<0.000000e+00> : vector<8x128xf32>
    %14 = tpu.matmul %12, %13, %cst_8 {dimension_numbers = #tpu.dot_dimension_numbers<[1], [0], [0], [1], [0, 0, 1, 1], [], []>} : vector<8x128xbf16>, vector<128x128xbf16>, vector<8x128xf32> -> vector<8x128xf32>
    %c0_9 = arith.constant 0 : index
    %c0_10 = arith.constant 0 : index
    %15 = vector.load %arg5[%c0_9, %c0_10] : memref<1x128xf32, #tpu.memory_space<vmem>>, vector<1x128xf32>
    %16 = vector.broadcast %15 : vector<1x128xf32> to vector<8x128xf32>
    %17 = arith.addf %14, %16 : vector<8x128xf32>
    %18 = arith.negf %17 : vector<8x128xf32>
    %19 = math.exp %18 : vector<8x128xf32>
    %cst_11 = arith.constant 1.000000e+00 : f32
    %20 = vector.broadcast %cst_11 : f32 to vector<8x128xf32>
    %21 = arith.addf %20, %19 : vector<8x128xf32>
    %22 = arith.divf %20, %21 : vector<8x128xf32>
    %23 = arith.truncf %22 : vector<8x128xf32> to vector<8x128xbf16>
    %c0_12 = arith.constant 0 : index
    %c0_13 = arith.constant 0 : index
    %24 = vector.load %arg6[%c0_12, %c0_13] : memref<128x128xbf16, #tpu.memory_space<vmem>>, vector<128x128xbf16>
    %cst_14 = arith.constant dense<0.000000e+00> : vector<8x128xf32>
    %25 = tpu.matmul %23, %24, %cst_14 {dimension_numbers = #tpu.dot_dimension_numbers<[1], [0], [0], [1], [0, 0, 1, 1], [], []>} : vector<8x128xbf16>, vector<128x128xbf16>, vector<8x128xf32> -> vector<8x128xf32>
    %c0_15 = arith.constant 0 : index
    %c0_16 = arith.constant 0 : index
    %26 = vector.load %arg7[%c0_15, %c0_16] : memref<1x128xf32, #tpu.memory_space<vmem>>, vector<1x128xf32>
    %27 = vector.broadcast %26 : vector<1x128xf32> to vector<8x128xf32>
    %28 = arith.addf %25, %27 : vector<8x128xf32>
    %29 = arith.negf %28 : vector<8x128xf32>
    %30 = math.exp %29 : vector<8x128xf32>
    %cst_17 = arith.constant 1.000000e+00 : f32
    %31 = vector.broadcast %cst_17 : f32 to vector<8x128xf32>
    %32 = arith.addf %31, %30 : vector<8x128xf32>
    %33 = arith.divf %31, %32 : vector<8x128xf32>
    %34 = arith.truncf %33 : vector<8x128xf32> to vector<8x128xbf16>
    %c0_18 = arith.constant 0 : index
    %c0_19 = arith.constant 0 : index
    %35 = vector.load %arg8[%c0_18, %c0_19] : memref<128x128xbf16, #tpu.memory_space<vmem>>, vector<128x128xbf16>
    %cst_20 = arith.constant dense<0.000000e+00> : vector<8x128xf32>
    %36 = tpu.matmul %34, %35, %cst_20 {dimension_numbers = #tpu.dot_dimension_numbers<[1], [0], [0], [1], [0, 0, 1, 1], [], []>} : vector<8x128xbf16>, vector<128x128xbf16>, vector<8x128xf32> -> vector<8x128xf32>
    %c0_21 = arith.constant 0 : index
    %c0_22 = arith.constant 0 : index
    %37 = vector.load %arg9[%c0_21, %c0_22] : memref<1x128xf32, #tpu.memory_space<vmem>>, vector<1x128xf32>
    %38 = vector.broadcast %37 : vector<1x128xf32> to vector<8x128xf32>
    %39 = arith.addf %36, %38 : vector<8x128xf32>
    %cst_23 = arith.constant dense<0xFF800000> : vector<8xf32>
    %40 = vector.multi_reduction <maximumf>, %39, %cst_23 [1] : vector<8x128xf32> to vector<8xf32>
    %41 = vector.shape_cast %40 : vector<8xf32> to vector<8x1xf32>
    %42 = vector.broadcast %41 : vector<8x1xf32> to vector<8x128xf32>
    %43 = arith.subf %39, %42 : vector<8x128xf32>
    %44 = math.exp %43 : vector<8x128xf32>
    %cst_24 = arith.constant dense<0.000000e+00> : vector<8xf32>
    %45 = vector.multi_reduction <add>, %44, %cst_24 [1] : vector<8x128xf32> to vector<8xf32>
    %46 = vector.shape_cast %45 : vector<8xf32> to vector<8x1xf32>
    %47 = math.log %46 : vector<8x1xf32>
    %48 = vector.broadcast %47 : vector<8x1xf32> to vector<8x128xf32>
    %49 = arith.subf %43, %48 : vector<8x128xf32>
    %50 = vector.extract_strided_slice %49 {offsets = [0, 0], sizes = [8, 10], strides = [1, 1]} : vector<8x128xf32> to vector<8x10xf32>
    %c0_25 = arith.constant 0 : index
    %c0_26 = arith.constant 0 : index
    %51 = vector.load %arg10[%c0_25, %c0_26] : memref<8x10xf32, #tpu.memory_space<vmem>>, vector<8x10xf32>
    tpu.vector_store %arg10[%c0_25, %c0_26], %50 {strides = array<i32>} : memref<8x10xf32, #tpu.memory_space<vmem>>, vector<8x10xf32>,
    return
  }
  func.func @transform_0(%arg0: i32) -> (i32, i32) {
    %c0_i32 = arith.constant 0 : i32
    %c0_i32_0 = arith.constant 0 : i32
    return %arg0, %c0_i32 : i32, i32
  }
  func.func @transform_1(%arg0: i32) -> (i32, i32) {
    %c0_i32 = arith.constant 0 : i32
    %c0_i32_0 = arith.constant 0 : i32
    %c0_i32_1 = arith.constant 0 : i32
    return %c0_i32, %c0_i32_0 : i32, i32
  }
  func.func @transform_2(%arg0: i32) -> (i32, i32) {
    %c0_i32 = arith.constant 0 : i32
    %c0_i32_0 = arith.constant 0 : i32
    %c0_i32_1 = arith.constant 0 : i32
    return %c0_i32, %c0_i32_0 : i32, i32
  }
  func.func @transform_3(%arg0: i32) -> (i32, i32) {
    %c0_i32 = arith.constant 0 : i32
    %c0_i32_0 = arith.constant 0 : i32
    %c0_i32_1 = arith.constant 0 : i32
    return %c0_i32, %c0_i32_0 : i32, i32
  }
  func.func @transform_4(%arg0: i32) -> (i32, i32) {
    %c0_i32 = arith.constant 0 : i32
    %c0_i32_0 = arith.constant 0 : i32
    %c0_i32_1 = arith.constant 0 : i32
    return %c0_i32, %c0_i32_0 : i32, i32
  }
  func.func @transform_5(%arg0: i32) -> (i32, i32) {
    %c0_i32 = arith.constant 0 : i32
    %c0_i32_0 = arith.constant 0 : i32
    %c0_i32_1 = arith.constant 0 : i32
    return %c0_i32, %c0_i32_0 : i32, i32
  }
  func.func @transform_6(%arg0: i32) -> (i32, i32) {
    %c0_i32 = arith.constant 0 : i32
    %c0_i32_0 = arith.constant 0 : i32
    %c0_i32_1 = arith.constant 0 : i32
    return %c0_i32, %c0_i32_0 : i32, i32
  }
  func.func @transform_7(%arg0: i32) -> (i32, i32) {
    %c0_i32 = arith.constant 0 : i32
    %c0_i32_0 = arith.constant 0 : i32
    %c0_i32_1 = arith.constant 0 : i32
    return %c0_i32, %c0_i32_0 : i32, i32
  }
  func.func @transform_8(%arg0: i32) -> (i32, i32) {
    %c0_i32 = arith.constant 0 : i32
    %c0_i32_0 = arith.constant 0 : i32
    %c0_i32_1 = arith.constant 0 : i32
    return %c0_i32, %c0_i32_0 : i32, i32
  }
  func.func @transform_9(%arg0: i32) -> (i32, i32) {
    %c0_i32 = arith.constant 0 : i32
    %c0_i32_0 = arith.constant 0 : i32
    return %arg0, %c0_i32 : i32, i32
  }
}

</mosaic_0001>

<bundles_post_ra>
// kernel: tpu_custom_call.1
= control target key start
LH: loop header
LB: loop body
LE: loop exit
PB: predicated region body
PF: predicated region fallthrough
CT: control target
= control target key end

     0   :  { %14 = vsyncpa [#allocation3], 0  ;;  %s1586_s0 = inlined_call_operand.hbm [shape: f32[8,784], index: 0, kind: input, shape index: {}]   ;;  %s1587_s1 = inlined_call_operand.hbm [shape: bf16[784,128], index: 1, kind: input, shape index: {}]   ;;  %s1588_s2 = inlined_call_operand.vmem [shape: f32[1,128], index: 2, kind: input, shape index: {}]   ;;  %s1589_s3 = inlined_call_operand.hbm [shape: bf16[128,128], index: 3, kind: input, shape index: {}]   ;;  %s1590_s4 = inlined_call_operand.vmem [shape: f32[1,128], index: 4, kind: input, shape index: {}]   ;;  %s1591_s5 = inlined_call_operand.hbm [shape: bf16[128,128], index: 5, kind: input, shape index: {}]   ;;  %s1592_s6 = inlined_call_operand.vmem [shape: f32[1,128], index: 6, kind: input, shape index: {}]   ;;  %s1593_s7 = inlined_call_operand.hbm [shape: bf16[128,128], index: 7, kind: input, shape index: {}]   ;;  %s1594_s8 = inlined_call_operand.vmem [shape: f32[1,128], index: 8, kind: input, shape index: {}]   ;;  %s1595_s9 = inlined_call_operand.hbm [shape: f32[8,10], index: 9, kind: output, shape index: {}]  }
   0x1   :  { %15 = vsyncpa [#allocation6], 0 }
   0x2   :  { %16 = vsyncpa [#allocation9], 0  ;;  %s33_s11 = sshll.u32 %s1587_s1, 4  ;;  %s34_s11 = int_to_ptr.hbm [resolvable:$true] %s33_s11 }
   0x3   :  { %17 = vsyncpa [#allocation4], 0  ;;  %s1498_s12 = smov [#allocation5]   ;;  %s63_s16 = sshll.u32 %s1591_s5, 4  ;;  %s64_s16 = int_to_ptr.hbm [resolvable:$true] %s63_s16 }
   0x4   :  { %s35_s13 = sshll.u32 %s1498_s12, 4  ;;  %s1499_s17 = smov 64   ;;  %s36_s13 = int_to_ptr.vmem [resolvable:$true] %s35_s13 }
   0x5   :  { %s1500_s18 = smov 4   ;;  %s1501_s19 = smov [#allocation8]  }
   0x6   :  { %41 = dma.hbm_to_vmem [thread:$0]  %s34_s11, 6272, %s36_s13, [#allocation6], %s1499_s17, %s1499_s17, %s1500_s18  }
   0x7   :  { %s65_s20 = sshll.u32 %s1501_s19, 4  ;;  %s23_s23 = sshll.u32 %s1586_s0, 4  ;;  %s66_s20 = int_to_ptr.vmem [resolvable:$true] %s65_s20  ;;  %s24_s23 = int_to_ptr.hbm [resolvable:$true] %s23_s23 }
   0x8   :  { %71 = dma.hbm_to_vmem [thread:$0]  %s64_s16, 1024, %s66_s20, [#allocation9], %s1499_s17, %s1499_s17, %s1500_s18  }
   0x9   :  { %s48_s25 = sshll.u32 %s1589_s3, 4  ;;  %s1502_s26 = smov [#allocation2]   ;;  %s49_s25 = int_to_ptr.hbm [resolvable:$true] %s48_s25 }
   0xa   :  { %s25_s27 = sshll.u32 %s1502_s26, 4  ;;  %s1503_s5 = smov [#allocation7]   ;;  %s26_s27 = int_to_ptr.vmem [resolvable:$true] %s25_s27 }
   0xb   :  { %28 = dma.hbm_to_vmem [thread:$0]  %s24_s23, 896, %s26_s27, [#allocation3]  }
   0xc   :  { %s50_s28 = sshll.u32 %s1503_s5, 4  ;;  %s78_s10 = sshll.u32 %s1593_s7, 4  ;;  %s51_s28 = int_to_ptr.vmem [resolvable:$true] %s50_s28  ;;  %s79_s10 = int_to_ptr.hbm [resolvable:$true] %s78_s10 }
   0xd   :  { %56 = dma.hbm_to_vmem [thread:$0]  %s49_s25, 1024, %s51_s28, [#allocation6], %s1499_s17, %s1499_s17, %s1500_s18  }
   0xe   :  { %s1504_s0 = smov [#allocation10]  }
   0xf   :  { %s80_s11 = sshll.u32 %s1504_s0, 4  ;;  %s81_s11 = int_to_ptr.vmem [resolvable:$true] %s80_s11 }
  0x10   :  { %86 = dma.hbm_to_vmem [thread:$0]  %s79_s10, 1024, %s81_s11, [#allocation9], %s1499_s17, %s1499_s17, %s1500_s18  }
  0x11   :  { %1490 = dma.done.wait [#allocation3], 896  }
  0x12   :  { %1491 = vsyncadd [#allocation3], 4294966400 }
  0x13   :  { %1492 = dma.done.wait [#allocation6], 7296  }
  0x14   :  { %1493 = vsyncadd [#allocation6], 4294960000 }
  0x15   :  { %1494 = dma.done.wait [#allocation9], 2048  }
  0x16   :  { %1495 = vsyncadd [#allocation9], 4294965248  ;;  %v1252_v0 = vld [vmem:[#allocation5 + $0x38] sm:$0xff]  ;;  %v1251_v3 = vld [vmem:[#allocation5 + $0x30] sm:$0xff]  ;;  %vm520_vm0 = vcmask 130048   ;;  %s1505_s15 = smov [#allocation11]  }
  0x17   :  { %v1260_v1 = vld [vmem:[#allocation5 + $0x78] sm:$0xff]  ;;  %524 = vmatpush.bf16.msra.mxu0 %v1252_v0  ;;  %v1259_v4 = vld [vmem:[#allocation5 + $0x70] sm:$0xff]  ;;  %v1250_v8 = vld [vmem:[#allocation5 + $0x28] sm:$0xff]  ;;  %s935_s16 = sshll.u32 %s1505_s15, 4  ;;  %s937_s19 = sshll.u32 %s1595_s9, 4  ;;  %vm928_vm13 = vcmask 80896   ;;  %s936_s16 = int_to_ptr.vmem [resolvable:$true] %s935_s16  ;;  %s938_s19 = int_to_ptr.hbm [resolvable:$true] %s937_s19 }
  0x18   :  { %v1268_v2 = vld [vmem:[#allocation5 + $0xb8] sm:$0xff]  ;;  %537 = vmatpush.bf16.msra.mxu1 %v1260_v1  ;;  %v1267_v5 = vld [vmem:[#allocation5 + $0xb0] sm:$0xff]  ;;  %v1258_v9 = vld [vmem:[#allocation5 + $0x68] sm:$0xff] }
  0x19   :  { %550 = vmatpush.bf16.msra.mxu2 %v1268_v2  ;;  %v1276_v6 = vld [vmem:[#allocation5 + $0xf8] sm:$0xff]  ;;  %v1275_v7 = vld [vmem:[#allocation5 + $0xf0] sm:$0xff]  ;;  %v1266_v10 = vld [vmem:[#allocation5 + $0xa8] sm:$0xff] }
  0x1a   :  { %563 = vmatpush.bf16.msra.mxu3 %v1276_v6  ;;  %v1274_v11 = vld [vmem:[#allocation5 + $0xe8] sm:$0xff]  ;;  %v1249_v12 = vld [vmem:[#allocation5 + $0x20] sm:$0xff]  ;;  %v1248_v16 = vld [vmem:[#allocation5 + $0x18] sm:$0xff] }
  0x1b   :  { %525 = vmatpush.bf16.msra.mxu0 %v1251_v3  ;;  %v1257_v13 = vld [vmem:[#allocation5 + $0x60] sm:$0xff]  ;;  %v1256_v17 = vld [vmem:[#allocation5 + $0x58] sm:$0xff]  ;;  %v1247_v20 = vld [vmem:[#allocation5 + $0x10] sm:$0xff] }
  0x1c   :  { %538 = vmatpush.bf16.msra.mxu1 %v1259_v4  ;;  %v1265_v14 = vld [vmem:[#allocation5 + $0xa0] sm:$0xff]  ;;  %v1264_v18 = vld [vmem:[#allocation5 + $0x98] sm:$0xff]  ;;  %v1255_v21 = vld [vmem:[#allocation5 + $0x50] sm:$0xff] }
  0x1d   :  { %551 = vmatpush.bf16.msra.mxu2 %v1267_v5  ;;  %v1273_v15 = vld [vmem:[#allocation5 + $0xe0] sm:$0xff]  ;;  %v1272_v19 = vld [vmem:[#allocation5 + $0xd8] sm:$0xff]  ;;  %v1263_v22 = vld [vmem:[#allocation5 + $0x90] sm:$0xff] }
  0x1e   :  { %564 = vmatpush.bf16.msra.mxu3 %v1275_v7  ;;  %v1271_v23 = vld [vmem:[#allocation5 + $0xd0] sm:$0xff]  ;;  %v1246_v24 = vld [vmem:[#allocation5 + $0x8] sm:$0xff]  ;;  %v1245_v27 = vld [vmem:[#allocation5] sm:$0xff] }
  0x1f   :  { %526 = vmatpush.bf16.msra.mxu0 %v1250_v8  ;;  %v1254_v25 = vld [vmem:[#allocation5 + $0x48] sm:$0xff]  ;;  %v1253_v29 = vld [vmem:[#allocation5 + $0x40] sm:$0xff]  ;;  %v111_v31 = vld [vmem:[#allocation2 + $0x8] sm:$0xff] }
  0x20   :  { %539 = vmatpush.bf16.msra.mxu1 %v1258_v9  ;;  %v1262_v26 = vld [vmem:[#allocation5 + $0x88] sm:$0xff]  ;;  %v1284_v32 = vld [vmem:[#allocation5 + $0x138] sm:$0xff]  ;;  %v1261_v34 = vld [vmem:[#allocation5 + $0x80] sm:$0xff]  ;;  %v118_v37 = vpack.c.bf16 %v111_v31, %v111_v31 }
  0x21   :  { %552 = vmatpush.bf16.msra.mxu2 %v1266_v10  ;;  %v1270_v28 = vld [vmem:[#allocation5 + $0xc8] sm:$0xff]  ;;  %v1292_v33 = vld [vmem:[#allocation5 + $0x178] sm:$0xff]  ;;  %v1269_v38 = vld [vmem:[#allocation5 + $0xc0] sm:$0xff] }
  0x22   :  { %565 = vmatpush.bf16.msra.mxu3 %v1274_v11  ;;  %v110_v30 = vld [vmem:[#allocation2] sm:$0xff]  ;;  %v112_v35 = vld [vmem:[#allocation2 + $0x10] sm:$0xff]  ;;  %v1293_v39 = vld [vmem:[#allocation5 + $0x180] sm:$0xff] }
  0x23   :  { %527 = vmatpush.bf16.msra.mxu0 %v1249_v12  ;;  %v117_v36 = vpack.c.bf16 %v110_v30, %v110_v30  ;;  %v113_v40 = vld [vmem:[#allocation2 + $0x18] sm:$0xff]  ;;  %v1283_v41 = vld [vmem:[#allocation5 + $0x130] sm:$0xff]  ;;  %v119_v43 = vpack.c.bf16 %v112_v35, %v112_v35  ;;  %v1282_v45 = vld [vmem:[#allocation5 + $0x128] sm:$0xff] }
  0x24   :  { %540 = vmatpush.bf16.msra.mxu1 %v1257_v13  ;;  %v1291_v42 = vld [vmem:[#allocation5 + $0x170] sm:$0xff]  ;;  %v120_v44 = vpack.c.bf16 %v113_v40, %v113_v40  ;;  %v1290_v46 = vld [vmem:[#allocation5 + $0x168] sm:$0xff]  ;;  %v1281_v47 = vld [vmem:[#allocation5 + $0x120] sm:$0xff] }
  0x25   :  { %553 = vmatpush.bf16.msra.mxu2 %v1265_v14  ;;  %v1289_v48 = vld [vmem:[#allocation5 + $0x160] sm:$0xff]  ;;  %v1280_v49 = vld [vmem:[#allocation5 + $0x118] sm:$0xff]  ;;  %v1279_v52 = vld [vmem:[#allocation5 + $0x110] sm:$0xff] }
  0x26   :  { %566 = vmatpush.bf16.msra.mxu3 %v1273_v15  ;;  %v1288_v50 = vld [vmem:[#allocation5 + $0x158] sm:$0xff]  ;;  %v1287_v53 = vld [vmem:[#allocation5 + $0x150] sm:$0xff]  ;;  %v1278_v55 = vld [vmem:[#allocation5 + $0x108] sm:$0xff] }
  0x27   :  { %528 = vmatpush.bf16.msra.mxu0 %v1248_v16  ;;  %v116_v51 = vld [vmem:[#allocation2 + $0x30] sm:$0xff]  ;;  %v1286_v56 = vld [vmem:[#allocation5 + $0x148] sm:$0xff]  ;;  %v1277_v57 = vld [vmem:[#allocation5 + $0x100] sm:$0xff] }
  0x28   :  { %541 = vmatpush.bf16.msra.mxu1 %v1256_v17  ;;  %v123_v54 = vpack.c.bf16 %v116_v51, %v116_v51  ;;  %v1285_v58 = vld [vmem:[#allocation5 + $0x140] sm:$0xff]  ;;  %v114_v59 = vld [vmem:[#allocation2 + $0x20] sm:$0xff]  ;;  %v115_v60 = vld [vmem:[#allocation2 + $0x28] sm:$0xff] }
  0x29   :  { %554 = vmatpush.bf16.msra.mxu2 %v1264_v18  ;;  %v121_v61 = vpack.c.bf16 %v114_v59, %v114_v59  ;;  %v122_v62 = vpack.c.bf16 %v115_v60, %v115_v60  ;;  %v1301_v1 = vld [vmem:[#allocation7 + $0x38] sm:$0xff]  ;;  %v1300_v2 = vld [vmem:[#allocation7 + $0x30] sm:$0xff]  ;;  %v1299_v6 = vld [vmem:[#allocation7 + $0x28] sm:$0xff] }
  0x2a   :  { %567 = vmatpush.bf16.msra.mxu3 %v1272_v19  ;;  %v1326_v8 = vld [vmem:[%s1588_s2] ss:$0 sm:$0xff]  ;;  %v1297_v10 = vld [vmem:[#allocation7 + $0x18] sm:$0xff]  ;;  %v1296_v14 = vld [vmem:[#allocation7 + $0x10] sm:$0xff] }
  0x2b   :  { %529 = vmatpush.bf16.msra.mxu0 %v1247_v20  ;;  %v1298_v9 = vld [vmem:[#allocation7 + $0x20] sm:$0xff]  ;;  %v1295_v16 = vld [vmem:[#allocation7 + $0x8] sm:$0xff] }
  0x2c   :  { %542 = vmatpush.bf16.msra.mxu1 %v1255_v21  ;;  %v1294_v19 = vld [vmem:[#allocation7] sm:$0xff] }
  0x2d   :  { %555 = vmatpush.bf16.msra.mxu2 %v1263_v22  ;;  %v1327_v51 = vld [vmem:[%s1590_s4] ss:$0 sm:$0xff] }
  0x2e   :  { %568 = vmatpush.bf16.msra.mxu3 %v1271_v23 }
  0x2f   :  { %530 = vmatpush.bf16.msra.mxu0 %v1246_v24 }
  0x30   :  { %543 = vmatpush.bf16.msra.mxu1 %v1254_v25 }
  0x31   :  { %556 = vmatpush.bf16.msra.mxu2 %v1262_v26 }
  0x32   :  { %569 = vmatpush.bf16.msra.mxu3 %v1270_v28 }
  0x33   :  { %531 = vmatpush.bf16.msra.mxu0 %v1245_v27 }
  0x34   :  { %544 = vmatpush.bf16.msra.mxu1 %v1253_v29 }
  0x35   :  { %557 = vmatpush.bf16.msra.mxu2 %v1261_v34 }
  0x36   :  { %532 = vmatmul.bf16.vlgmr.msra.gmra.mxu0 %v117_v36  ;;  %570 = vmatpush.bf16.msra.mxu3 %v1269_v38 }
  0x37   :  { %576 = vmatpush.bf16.msrb.mxu0 %v1284_v32  ;;  %545 = vmatmul.bf16.vlgmr.msra.gmra.mxu1 %v118_v37 }
  0x38   :  { %589 = vmatpush.bf16.msrb.mxu1 %v1292_v33  ;;  %558 = vmatmul.bf16.vlgmr.msra.gmra.mxu2 %v119_v43  ;;  %v1309_v43 = vld [vmem:[#allocation8 + $0x38] sm:$0xff] }
  0x39   :  { %609 = vmatpush.bf16.msrb.mxu2 %v1293_v39  ;;  %571 = vmatmul.bf16.vlgmr.msra.gmra.mxu3 %v120_v44  ;;  %v1308_v44 = vld [vmem:[#allocation8 + $0x30] sm:$0xff] }
  0x3a   :  { %703 = vmatpush.bf16.msrb.mxu3 %v1301_v1 }
  0x3b   :  { %577 = vmatpush.bf16.msrb.mxu0 %v1283_v41 }
  0x3c   :  { %590 = vmatpush.bf16.msrb.mxu1 %v1291_v42 }
  0x3d   :  { %804 = vmatpush.bf16.msra.mxu2 %v1309_v43 }
  0x3e   :  { %704 = vmatpush.bf16.msrb.mxu3 %v1300_v2 }
  0x3f   :  { %578 = vmatpush.bf16.msrb.mxu0 %v1282_v45  ;;  %v1307_v45 = vld [vmem:[#allocation8 + $0x28] sm:$0xff] }
  0x40   :  { %591 = vmatpush.bf16.msrb.mxu1 %v1290_v46  ;;  %v1306_v46 = vld [vmem:[#allocation8 + $0x20] sm:$0xff] }
  0x41   :  { %805 = vmatpush.bf16.msra.mxu2 %v1308_v44 }
  0x42   :  { %705 = vmatpush.bf16.msrb.mxu3 %v1299_v6  ;;  %v1316_v6 = vld [vmem:[#allocation10 + $0x30] sm:$0xff] }
  0x43   :  { %579 = vmatpush.bf16.msrb.mxu0 %v1281_v47  ;;  %v1305_v47 = vld [vmem:[#allocation8 + $0x18] sm:$0xff] }
  0x44   :  { %592 = vmatpush.bf16.msrb.mxu1 %v1289_v48  ;;  %v1304_v48 = vld [vmem:[#allocation8 + $0x10] sm:$0xff] }
  0x45   :  { %806 = vmatpush.bf16.msra.mxu2 %v1307_v45 }
  0x46   :  { %706 = vmatpush.bf16.msrb.mxu3 %v1298_v9  ;;  %v1313_v9 = vld [vmem:[#allocation10 + $0x18] sm:$0xff] }
  0x47   :  { %580 = vmatpush.bf16.msrb.mxu0 %v1280_v49  ;;  %v1303_v49 = vld [vmem:[#allocation8 + $0x8] sm:$0xff] }
  0x48   :  { %593 = vmatpush.bf16.msrb.mxu1 %v1288_v50  ;;  %1145 = vmatmul.msk.bf16.vlgmr.msrb.gmra.mxu2 %vm520_vm0, %v123_v54  ;;  %v1302_v50 = vld [vmem:[#allocation8] sm:$0xff] }
  0x49   :  { %807 = vmatpush.bf16.msra.mxu2 %v1306_v46 }
  0x4a   :  { %707 = vmatpush.bf16.msrb.mxu3 %v1297_v10  ;;  %v1312_v10 = vld [vmem:[#allocation10 + $0x10] sm:$0xff] }
  0x4b   :  { %581 = vmatpush.bf16.msrb.mxu0 %v1279_v52 }
  0x4c   :  { %594 = vmatpush.bf16.msrb.mxu1 %v1287_v53 }
  0x4d   :  { %808 = vmatpush.bf16.msra.mxu2 %v1305_v47 }
  0x4e   :  { %708 = vmatpush.bf16.msrb.mxu3 %v1296_v14 }
  0x4f   :  { %582 = vmatpush.bf16.msrb.mxu0 %v1278_v55 }
  0x50   :  { %595 = vmatpush.bf16.msrb.mxu1 %v1286_v56 }
  0x51   :  { %809 = vmatpush.bf16.msra.mxu2 %v1304_v48 }
  0x52   :  { %709 = vmatpush.bf16.msrb.mxu3 %v1295_v16 }
  0x53   :  { %583 = vmatpush.bf16.msrb.mxu0 %v1277_v57 }
  0x54   :  { %596 = vmatpush.bf16.msrb.mxu1 %v1285_v58 }
  0x55   :  { %810 = vmatpush.bf16.msra.mxu2 %v1303_v49 }
  0x56   :  { %584 = vmatmul.bf16.vlgmr.msrb.gmra.mxu0 %v121_v61  ;;  %710 = vmatpush.bf16.msrb.mxu3 %v1294_v19 }
  0x57   :  { %597 = vmatmul.bf16.vlgmr.msrb.gmra.mxu1 %v122_v62 }
  0x59   :  { %811 = vmatpush.bf16.msra.mxu2 %v1302_v50 }
  0xb3   :  { %v533_v63 = vpop.f32.mrf.mxu0 }
  0xb4   :  { %v546_v0 = vpop.f32.mrf.mxu1  ;;  %v534_v11 = vadd.f32 %v1326_v8, %v533_v63  ;;  %v1314_v8 = vld [vmem:[#allocation10 + $0x20] sm:$0xff] }
  0xb6   :  { %v547_v15 = vadd.f32 %v546_v0, %v534_v11  ;;  %v1311_v11 = vld [vmem:[#allocation10 + $0x8] sm:$0xff] }
  0xbb   :  { %v535_v3 = vpop.f32.mrf.mxu0  ;;  %v559_v5 = vpop.f32.mrf.mxu2 }
  0xbc   :  { %v548_v4 = vpop.f32.mrf.mxu1  ;;  %v572_v7 = vpop.f32.mrf.mxu3  ;;  %v560_v17 = vadd.f32 %v559_v5, %v547_v15  ;;  %v1317_v5 = vld [vmem:[#allocation10 + $0x38] sm:$0xff] }
  0xbd   :  { %905 = vmatpush.bf16.msra.mxu0 %v1317_v5 }
  0xbe   :  { %v573_v20 = vadd.f32 %v572_v7, %v560_v17  ;;  %v1315_v7 = vld [vmem:[#allocation10 + $0x28] sm:$0xff] }
  0xc1   :  { %906 = vmatpush.bf16.msra.mxu0 %v1316_v6 }
  0xc3   :  { %v561_v12 = vpop.f32.mrf.mxu2 }
  0xc4   :  { %v574_v13 = vpop.f32.mrf.mxu3  ;;  %v1310_v12 = vld [vmem:[#allocation10] sm:$0xff] }
  0xc5   :  { %907 = vmatpush.bf16.msra.mxu0 %v1315_v7  ;;  %v1328_v13 = vld [vmem:[%s1592_s6] ss:$0 sm:$0xff] }
  0xc9   :  { %908 = vmatpush.bf16.msra.mxu0 %v1314_v8 }
  0xcb   :  { %v611_v18 = vpop.f32.mrf.mxu2 }
  0xcd   :  { %909 = vmatpush.bf16.msra.mxu0 %v1313_v9 }
  0xd1   :  { %910 = vmatpush.bf16.msra.mxu0 %v1312_v10 }
  0xd3   :  { %v585_v21 = vpop.f32.mrf.mxu0  ;;  %v613_v25 = vpop.f32.mrf.mxu2 }
  0xd4   :  { %v598_v22 = vpop.f32.mrf.mxu1  ;;  %v586_v23 = vadd.f32 %v585_v21, %v573_v20 }
  0xd5   :  { %911 = vmatpush.bf16.msra.mxu0 %v1311_v11 }
  0xd6   :  { %v599_v24 = vadd.f32 %v598_v22, %v586_v23 }
  0xd8   :  { %v612_v26 = vadd.f32 %v611_v18, %v599_v24 }
  0xd9   :  { %912 = vmatpush.bf16.msra.mxu0 %v1310_v12 }
  0xda   :  { %v1146_v27 = vmul.f32 -1.442695, %v612_v26 }
  0xdb   :  { %v587_v28 = vpop.f32.mrf.mxu0 }
  0xdc   :  { %v600_v29 = vpop.f32.mrf.mxu1  ;;  %1330 = vpow2.f32 %v1146_v27 }
  0xe2   :  { %v1331_v30 = vpop.eup %1330 }
  0xe3   :  { %v618_v31 = vadd.f32 1.0, %v1331_v30 }
  0xe5   :  { %1332 = vrcp.f32 %v618_v31  ;;  %v630_v35 = vand.u32 2147483648, %v618_v31  ;;  %v628_v37 = vand.u32 2147483647, %v618_v31  ;;  %vm624_vm2 = vweird.f32 %v618_v31 }
  0xe7   :  { %v631_v39 = vor.u32 1.1754944e-38, %v630_v35  ;;  %vm629_vm4 = vcmp.eq.f32.partialorder %v628_v37, 8.507059e+37 }
  0xeb   :  { %v1333_v32 = vpop.eup %1332 }
  0xec   :  { %v620_v33 = vmul.f32 %v1333_v32, %v618_v31  ;;  %vm625_vm1 = vweird.f32 %v1333_v32  ;;  %v1329_v31 = vld [vmem:[%s1594_s8] ss:$0 sm:$0xff] }
  0xed   :  { %vm626_vm3 = vmor %vm624_vm2, %vm625_vm1 }
  0xee   :  { %v621_v34 = vsub.f32 1.0, %v620_v33 }
  0xf0   :  { %v622_v36 = vmul.f32 %v1333_v32, %v621_v34 }
  0xf2   :  { %v623_v38 = vadd.f32 %v1333_v32, %v622_v36 }
  0xf4   :  { %v627_v40 = vsel %vm626_vm3, %v1333_v32, %v623_v38 }
  0xf5   :  { %v632_v41 = vsel %vm629_vm4, %v631_v39, %v627_v40 }
  0xf6   :  { %v634_v42 = vpack.c.bf16 %v632_v41, %v632_v41 }
  0xf8   :  { %711 = vmatmul.bf16.vlgmr.msrb.gmra.mxu3 %v634_v42 }
 0x17b   :  { %v712_v52 = vpop.f32.mrf.mxu3 }
 0x17c   :  { %v713_v53 = vadd.f32 %v1327_v51, %v712_v52 }
 0x17e   :  { %v1179_v54 = vmul.f32 -1.442695, %v713_v53 }
 0x180   :  { %1334 = vpow2.f32 %v1179_v54 }
 0x183   :  { %v714_v55 = vpop.f32.mrf.mxu3 }
 0x186   :  { %v1335_v56 = vpop.eup %1334 }
 0x187   :  { %v719_v57 = vadd.f32 1.0, %v1335_v56 }
 0x189   :  { %1336 = vrcp.f32 %v719_v57  ;;  %v731_v61 = vand.u32 2147483648, %v719_v57  ;;  %v729_v63 = vand.u32 2147483647, %v719_v57  ;;  %vm725_vm6 = vweird.f32 %v719_v57 }
 0x18b   :  { %v732_v1 = vor.u32 1.1754944e-38, %v731_v61  ;;  %vm730_vm8 = vcmp.eq.f32.partialorder %v729_v63, 8.507059e+37 }
 0x18f   :  { %v1337_v58 = vpop.eup %1336 }
 0x190   :  { %v721_v59 = vmul.f32 %v1337_v58, %v719_v57  ;;  %vm726_vm5 = vweird.f32 %v1337_v58 }
 0x191   :  { %vm727_vm7 = vmor %vm725_vm6, %vm726_vm5 }
 0x192   :  { %v722_v60 = vsub.f32 1.0, %v721_v59 }
 0x194   :  { %v723_v62 = vmul.f32 %v1337_v58, %v722_v60 }
 0x196   :  { %v724_v0 = vadd.f32 %v1337_v58, %v723_v62 }
 0x198   :  { %v728_v2 = vsel %vm727_vm7, %v1337_v58, %v724_v0 }
 0x199   :  { %v733_v3 = vsel %vm730_vm8, %v732_v1, %v728_v2 }
 0x19a   :  { %v735_v4 = vpack.c.bf16 %v733_v3, %v733_v3 }
 0x19c   :  { %812 = vmatmul.bf16.vlgmr.msra.gmra.mxu2 %v735_v4 }
 0x21f   :  { %v813_v14 = vpop.f32.mrf.mxu2 }
 0x220   :  { %v814_v15 = vadd.f32 %v1328_v13, %v813_v14 }
 0x222   :  { %v1212_v16 = vmul.f32 -1.442695, %v814_v15 }
 0x224   :  { %1338 = vpow2.f32 %v1212_v16 }
 0x227   :  { %v815_v17 = vpop.f32.mrf.mxu2 }
 0x22a   :  { %v1339_v18 = vpop.eup %1338 }
 0x22b   :  { %v820_v19 = vadd.f32 1.0, %v1339_v18 }
 0x22d   :  { %1340 = vrcp.f32 %v820_v19  ;;  %v832_v23 = vand.u32 2147483648, %v820_v19  ;;  %v830_v25 = vand.u32 2147483647, %v820_v19  ;;  %vm826_vm10 = vweird.f32 %v820_v19 }
 0x22f   :  { %v833_v27 = vor.u32 1.1754944e-38, %v832_v23  ;;  %vm831_vm12 = vcmp.eq.f32.partialorder %v830_v25, 8.507059e+37 }
 0x233   :  { %v1341_v20 = vpop.eup %1340 }
 0x234   :  { %v822_v21 = vmul.f32 %v1341_v20, %v820_v19  ;;  %vm827_vm9 = vweird.f32 %v1341_v20 }
 0x235   :  { %vm828_vm11 = vmor %vm826_vm10, %vm827_vm9 }
 0x236   :  { %v823_v22 = vsub.f32 1.0, %v822_v21 }
 0x238   :  { %v824_v24 = vmul.f32 %v1341_v20, %v823_v22 }
 0x23a   :  { %v825_v26 = vadd.f32 %v1341_v20, %v824_v24 }
 0x23c   :  { %v829_v28 = vsel %vm828_vm11, %v1341_v20, %v825_v26 }
 0x23d   :  { %v834_v29 = vsel %vm831_vm12, %v833_v27, %v829_v28 }
 0x23e   :  { %v836_v30 = vpack.c.bf16 %v834_v29, %v834_v29 }
 0x240   :  { %913 = vmatmul.bf16.vlgmr.msra.gmra.mxu0 %v836_v30 }
 0x2bd   :  { %v914_v32 = vpop.f32.mrf.mxu0 }
 0x2be   :  { %v915_v33 = vadd.f32 %v1329_v31, %v914_v32 }
 0x2c0   :  { %918 = vmax.xlane.f32.xlu0 %v915_v33 }
 0x2c5   :  { %v916_v34 = vpop.f32.mrf.mxu0 }
 0x333   :  { %v919_v35 = vpop.xlane.xlu0 %918 }
 0x334   :  { %v920_v36 = vsub.f32 %v915_v33, %v919_v35 }
 0x336   :  { %v921_v37 = vmul.f32 1.442695, %v920_v36 }
 0x338   :  { %1342 = vpow2.f32 %v921_v37 }
 0x33e   :  { %v1343_v38 = vpop.eup %1342 }
 0x33f   :  { %923 = vadd.xlane.f32.xlu0 %v1343_v38 }
 0x3b2   :  { %v924_v39 = vpop.xlane.xlu0 %923 }
 0x3b3   :  { %1344 = vlog2.f32 %v924_v39 }
 0x3b9   :  { %v1345_v40 = vpop.eup %1344 }
 0x3ba   :  { %v926_v41 = vmul.f32 0.6931472, %v1345_v40 }
 0x3bc   :  { %v927_v42 = vsub.f32 %v920_v36, %v926_v41 }
 0x3be   :  { %929 = vst.msk [vmem:[#allocation11] sm:$0xff] %vm928_vm13, %v927_v42 }
 0x3bf   :  { %940 = dma.vmem_to_hbm [thread:$0]  %s936_s16, 128, %s938_s19, [#allocation4]  }
 0x3c0   :  { %1496 = dma.done.wait [#allocation4], 128  }
 0x3c1   :  { %1497 = vsyncadd [#allocation4], 4294967168 }
 0x3c2   :  { %945 = vsyncpa [#allocation3], 1 }
 0x3c3   :  { %946 = vsyncpa [#allocation6], 1 }
 0x3c4   :  { %947 = vsyncpa [#allocation9], 1 }
 0x3c5   :  { %948 = vsyncpa [#allocation4], 1 }

</bundles_post_ra>
